<compile_context>
chip_gen: v6e
topology: v6e:2x2x1
jax: 0.10.0
libtpu: 0.0.40
codegen_flags: <defaults>
</compile_context>

<pallas_src>
import jax
import jax.numpy as jnp
from jax.experimental import pallas as pl
from jax.experimental.pallas import tpu as pltpu


# -----------------------------------------------------------------------------
# Kernels
# -----------------------------------------------------------------------------
def _mass_kernel_full(m_ref, u_ref, o_ref):
    """update has the same (2-D slab) shape as masses."""
    o_ref[...] = jnp.maximum(m_ref[...] + u_ref[...], 0.0)


def _mass_kernel_scalar(u_ref, m_ref, o_ref):
    """update is a single f32 scalar (SMEM) broadcast over the masses block."""
    u = u_ref[0]
    o_ref[...] = jnp.maximum(m_ref[...] + u, 0.0).astype(o_ref.dtype)


# -----------------------------------------------------------------------------
# Layout selection
# -----------------------------------------------------------------------------
_LANE = 128
_MAX_LANE_COLS = 2048                       # lane-dense column width
_TARGET_BLOCK_BYTES = 4 * 1024 * 1024       # ~4 MiB per array per block
_MIN_PIPELINE_BYTES = 1 * 1024 * 1024       # slabs above this keep >= 4 steps
_MIN_GRID_STEPS = 4
_VMEM_LIMIT_BYTES = 48 * 1024 * 1024        # > v5e 16 MiB default, < v7x 64 MiB


def _sublane(itemsize: int) -> int:
    """Sublane packing granularity: f32 -> 8, bf16 -> 16, 8-bit -> 32."""
    return 8 * max(1, 4 // max(1, itemsize))


def _pick_lane_cols(n: int):
    """Largest power-of-two multiple of 128 (<= 2048) dividing n, else None."""
    c = _MAX_LANE_COLS
    while c >= _LANE:
        if n % c == 0:
            return c
        c //= 2
    return None


def _pick_block_rows(rows: int, cols: int, itemsize: int, target_block_bytes: int):
    """Pick (block_rows, grid_steps) for a (rows, cols) slab."""
    sub = _sublane(itemsize)
    row_bytes = cols * itemsize
    br = max(sub, (target_block_bytes // max(1, row_bytes)) // sub * sub)
    slab_bytes = rows * row_bytes
    if slab_bytes > _MIN_PIPELINE_BYTES:
        # Keep >= _MIN_GRID_STEPS blocks so DMA-in / compute / DMA-out overlap;
        # a 1-step grid serializes them and sits 2-3x off the HBM roofline.
        cap = max(sub, (rows // _MIN_GRID_STEPS) // sub * sub)
        br = min(br, cap)
    if br >= rows:
        return rows, 1                       # single full-array block
    return br, pl.cdiv(rows, br)             # partial edge block is masked


def _grid_semantics(grid_steps: int):
    """CORE_PARALLEL on multi-TC chips (v7x) so both TensorCores stream HBM;
    plain 'parallel' elsewhere (no-op on single-TC v5e/v6e)."""
    if grid_steps >= 2:
        try:
            kind = jax.devices()[0].device_kind.lower()
        except Exception:  # pragma: no cover - defensive
            kind = ""
        if "v7" in kind and hasattr(pltpu, "CORE_PARALLEL"):
            return (pltpu.CORE_PARALLEL,)
    return ("parallel",)


# -----------------------------------------------------------------------------
# Wrapper
# -----------------------------------------------------------------------------
def mass_model_forward(masses: jax.Array, update: jax.Array,
                       uniform_density: bool, *,
                       out_dtype=None,
                       donate_masses: bool = False,
                       target_block_bytes: int = _TARGET_BLOCK_BYTES) -> jax.Array:
    """Pallas equivalent of MassModel.forward() == relu(masses + update).

    out_dtype: optionally force a storage dtype (e.g. jnp.bfloat16 to halve
               HBM traffic).  Default follows torch type promotion.
    donate_masses: emit input_output_aliases so the masses slab buffer is
               reused for the output.  Pair with jit donate_argnums; when the
               input is not donatable XLA inserts a defensive copy.
    """
    orig_shape = masses.shape
    n = masses.size
    dtype = jnp.dtype(out_dtype) if out_dtype is not None else \
        jnp.result_type(masses.dtype, update.dtype)
    if n == 0:
        return jnp.zeros(orig_shape, dtype=dtype)
    itemsize = dtype.itemsize

    masses = masses.astype(dtype)
    update = update.astype(dtype)

    # ---- choose a 2-D slab view (zero-copy whenever possible) ---------------
    pad = 0
    cols = _pick_lane_cols(n)
    if cols is not None:
        # Lane-dense slab: free reshape, wide unmasked vst stores.
        rows = n // cols
        view = lambda x: x.reshape(rows, cols)
    else:
        last = int(orig_shape[-1]) if len(orig_shape) else 1
        if 0 < last * itemsize * _sublane(itemsize) <= target_block_bytes:
            # Natural (prod(leading), last_dim) view: still zero-copy; edge-lane
            # stores are masked, which only matters for tiny/ragged inputs.
            cols = last
            rows = n // cols
            view = lambda x: x.reshape(rows, cols)
        else:
            # TODO(synk): rare large-ragged-last-dim case; pad + slice costs one
            # extra HBM round trip.  A 1-D masked-block layout would avoid it.
            cols = _MAX_LANE_COLS
            rows = pl.cdiv(n, cols)
            pad = rows * cols - n
            view = lambda x: jnp.pad(x.reshape(-1), (0, pad)).reshape(rows, cols)

    block_rows, grid_steps = _pick_block_rows(rows, cols, itemsize,
                                              target_block_bytes)
    tile_spec = pl.BlockSpec((block_rows, cols), lambda i: (i, 0))
    out_shape = jax.ShapeDtypeStruct((rows, cols), dtype)
    cparams = pltpu.CompilerParams(
        dimension_semantics=_grid_semantics(grid_steps),
        vmem_limit_bytes=_VMEM_LIMIT_BYTES)

    m2d = view(masses)

    if uniform_density:
        # Scalar update stays f32 in SMEM (SMEM is a 32-bit scalar path); the
        # kernel casts the result to the output dtype on store.
        cost = pl.CostEstimate(flops=2 * n, transcendentals=0,
                               bytes_accessed=2 * n * itemsize + 4)
        out2d = pl.pallas_call(
            _mass_kernel_scalar,
            out_shape=out_shape,
            grid=(grid_steps,),
            in_specs=[
                pl.BlockSpec(memory_space=pltpu.SMEM),   # scalar update, (1,)
                tile_spec,                               # masses block
            ],
            out_specs=tile_spec,
            compiler_params=cparams,
            cost_estimate=cost,
            input_output_aliases={1: 0} if donate_masses else {},
        )(update.reshape(1).astype(jnp.float32), m2d)
    else:
        cost = pl.CostEstimate(flops=2 * n, transcendentals=0,
                               bytes_accessed=3 * n * itemsize)
        out2d = pl.pallas_call(
            _mass_kernel_full,
            out_shape=out_shape,
            grid=(grid_steps,),
            in_specs=[tile_spec, tile_spec],
            out_specs=tile_spec,
            compiler_params=cparams,
            cost_estimate=cost,
            input_output_aliases={0: 0} if donate_masses else {},
        )(m2d, view(update))

    if pad:
        return out2d.reshape(-1)[:n].reshape(orig_shape)
    return out2d.reshape(orig_shape)


# -----------------------------------------------------------------------------
# Deterministic parameter init (mirrors MassModel.__init__)
# -----------------------------------------------------------------------------
def init_mass_model(key, masses_shape, uniform_density: bool):
    """torch.rand(...) * 0.1 -> jax.random.uniform(...) * 0.1 (deterministic)."""
    if uniform_density:
        return jax.random.uniform(key, (1,), dtype=jnp.float32) * 0.1
    return jax.random.uniform(key, masses_shape, dtype=jnp.float32) * 0.1


if __name__ == "__main__":
    key = jax.random.PRNGKey(0)
    (k_m, k_u_full, k_u_scalar, k_m2, k_u2,
     k_m3, k_u3, k_m4, k_u4) = jax.random.split(key, 9)

    # 1) Lane-dense zero-copy path, non-uniform update (16 x 128 -> one block).
    masses_shape = (16, 128)
    masses = (jax.random.uniform(k_m, masses_shape, dtype=jnp.float32) - 0.5) * 2.0
    update_full = init_mass_model(k_u_full, masses_shape, uniform_density=False)
    out_full = jax.block_until_ready(
        mass_model_forward(masses, update_full, uniform_density=False))
    ref_full = jnp.maximum(masses + update_full, 0.0)
    assert out_full.shape == masses.shape and out_full.dtype == masses.dtype
    assert jnp.allclose(out_full, ref_full, atol=1e-6), "non-uniform mismatch"

    # 2) Uniform density (scalar update broadcast from SMEM).
    update_scalar = init_mass_model(k_u_scalar, masses_shape, uniform_density=True)
    out_scalar = jax.block_until_ready(
        mass_model_forward(masses, update_scalar, uniform_density=True))
    ref_scalar = jnp.maximum(masses + update_scalar[0], 0.0)
    assert jnp.allclose(out_scalar, ref_scalar, atol=1e-6), "uniform mismatch"

    # 3) Ragged shape -> zero-copy natural 2-D view (no pad, no output slice).
    odd_shape = (7, 19)
    masses_odd = (jax.random.uniform(k_m2, odd_shape, dtype=jnp.float32) - 0.5) * 2.0
    update_odd = init_mass_model(k_u2, odd_shape, uniform_density=False)
    out_odd = jax.block_until_ready(
        mass_model_forward(masses_odd, update_odd, uniform_density=False))
    assert jnp.allclose(out_odd, jnp.maximum(masses_odd + update_odd, 0.0),
                        atol=1e-6), "odd-shape mismatch"

    # 4) Multi-block grid with a masked partial edge block (forced small blocks)
    #    plus the input_output_aliases path under jit.
    shape4 = (20, 2048)
    masses4 = (jax.random.uniform(k_m3, shape4, dtype=jnp.float32) - 0.5) * 2.0
    update4 = init_mass_model(k_u3, shape4, uniform_density=False)
    ref4 = jnp.maximum(masses4 + update4, 0.0)
    out4 = jax.block_until_ready(
        mass_model_forward(masses4, update4, uniform_density=False,
                           target_block_bytes=8 * 2048 * 4))   # 8-row blocks, grid=3
    assert jnp.allclose(out4, ref4, atol=1e-6), "partial-block mismatch"

    fwd_aliased = jax.jit(lambda m, u: mass_model_forward(
        m, u, uniform_density=False, donate_masses=True))
    out4a = jax.block_until_ready(fwd_aliased(jnp.array(masses4), update4))
    assert jnp.allclose(out4a, ref4, atol=1e-6), "aliased-output mismatch"

    # 5) Mid-size slab (2 MiB) -> pipelined >= 4 grid steps, uniform update.
    shape5 = (256, 2048)
    masses5 = (jax.random.uniform(k_m4, shape5, dtype=jnp.float32) - 0.5) * 2.0
    update5 = init_mass_model(k_u4, shape5, uniform_density=True)
    out5 = jax.block_until_ready(
        mass_model_forward(masses5, update5, uniform_density=True))
    assert jnp.allclose(out5, jnp.maximum(masses5 + update5[0], 0.0),
                        atol=1e-6), "pipelined-uniform mismatch"

    # 6) Optional bf16 storage path (halves HBM traffic).
    out_bf16 = jax.block_until_ready(
        mass_model_forward(masses, update_full, uniform_density=False,
                           out_dtype=jnp.bfloat16))
    assert out_bf16.dtype == jnp.bfloat16
    assert jnp.allclose(out_bf16.astype(jnp.float32), ref_full,
                        atol=5e-2), "bf16 mismatch"

    print("KERNEL_OK")
</pallas_src>

<mosaic_0001>
module attributes {stable_mosaic.version = 11 : i64} {
  func.func @_mass_kernel_full(%arg0: i32, %arg1: memref<1x2048xf32, #tpu.memory_space<vmem>>, %arg2: memref<1x2048xf32, #tpu.memory_space<vmem>>, %arg3: memref<1x2048xf32, #tpu.memory_space<vmem>>) attributes {dimension_semantics = [#tpu.dimension_semantics<parallel>], iteration_bounds = array<i64: 1>, scalar_prefetch = 0 : i64, scratch_operands = 0 : i64, tpu.core_type = #tpu.core_type<tc>, window_params = [{transform_indices = @transform_0, window_bounds = array<i64: 1, 2048>}, {transform_indices = @transform_1, window_bounds = array<i64: 1, 2048>}, {transform_indices = @transform_2, window_bounds = array<i64: 1, 2048>}]} {
    %c0 = arith.constant 0 : index
    %c0_0 = arith.constant 0 : index
    %0 = vector.load %arg1[%c0, %c0_0] : memref<1x2048xf32, #tpu.memory_space<vmem>>, vector<1x2048xf32>
    %c0_1 = arith.constant 0 : index
    %c0_2 = arith.constant 0 : index
    %1 = vector.load %arg2[%c0_1, %c0_2] : memref<1x2048xf32, #tpu.memory_space<vmem>>, vector<1x2048xf32>
    %2 = arith.addf %0, %1 : vector<1x2048xf32>
    %cst = arith.constant 0.000000e+00 : f32
    %3 = vector.broadcast %cst : f32 to vector<1x2048xf32>
    %4 = arith.maximumf %2, %3 : vector<1x2048xf32>
    %c0_3 = arith.constant 0 : index
    %c0_4 = arith.constant 0 : index
    %5 = vector.load %arg3[%c0_3, %c0_4] : memref<1x2048xf32, #tpu.memory_space<vmem>>, vector<1x2048xf32>
    tpu.vector_store %arg3[%c0_3, %c0_4], %4 {strides = array<i32>} : memref<1x2048xf32, #tpu.memory_space<vmem>>, vector<1x2048xf32>,
    return
  }
  func.func @transform_0(%arg0: i32) -> (i32, i32) {
    %c0_i32 = arith.constant 0 : i32
    %c0_i32_0 = arith.constant 0 : i32
    return %arg0, %c0_i32 : i32, i32
  }
  func.func @transform_1(%arg0: i32) -> (i32, i32) {
    %c0_i32 = arith.constant 0 : i32
    %c0_i32_0 = arith.constant 0 : i32
    return %arg0, %c0_i32 : i32, i32
  }
  func.func @transform_2(%arg0: i32) -> (i32, i32) {
    %c0_i32 = arith.constant 0 : i32
    %c0_i32_0 = arith.constant 0 : i32
    return %arg0, %c0_i32 : i32, i32
  }
}

</mosaic_0001>

<bundles_post_ra>
// kernel: tpu_custom_call.1
= control target key start
LH: loop header
LB: loop body
LE: loop exit
PB: predicated region body
PF: predicated region fallthrough
CT: control target
= control target key end

     0   :  { %7 = vsyncpa [#allocation3], 0  ;;  %s158_s0 = inlined_call_operand.hbm [shape: f32[1,2048], index: 0, kind: input, shape index: {}]   ;;  %s159_s1 = inlined_call_operand.hbm [shape: f32[1,2048], index: 1, kind: input, shape index: {}]   ;;  %s160_s2 = inlined_call_operand.hbm [shape: f32[1,2048], index: 2, kind: output, shape index: {}]  }
   0x1   :  { %8 = vsyncpa [#allocation6], 0 }
   0x2   :  { %9 = vsyncpa [#allocation4], 0  ;;  %s131_s9 = smov [#allocation2]   ;;  %s132_s11 = smov [#allocation5]  }
   0x3   :  { %s16_s10 = sshll.u32 %s131_s9, 4  ;;  %s26_s12 = sshll.u32 %s132_s11, 4  ;;  %s17_s10 = int_to_ptr.vmem [resolvable:$true] %s16_s10  ;;  %s27_s12 = int_to_ptr.vmem [resolvable:$true] %s26_s12 }
   0x4   :  { %s73_s13 = scalar_lea.vmem %s17_s10, 256  ;;  %p78_p1 = scmp.lt.s32.totalorder %s17_s10, %s17_s10 }
   0x5   :  { %p74_p0 = scmp.ne.s32.totalorder %s17_s10, %s73_s13  ;;  %p79_p2 = scmp.lt.s32.totalorder %s73_s13, %s73_s13 }
   0x7   :  { %p80_p3 = por %p79_p2, %p78_p1 }
   0x9   :  { %p81_p4 = pnand %p80_p3, %p74_p0 }
   0xb   :  { %84 = shalt.err (!%p81_p4)
}
   0xc   :  { %19 = dma.hbm_to_vmem [thread:$0]  %s158_s0, 256, %s17_s10, [#allocation3]  }
   0xd   :  { %s93_s16 = scalar_lea.vmem %s27_s12, 256  ;;  %p98_p6 = scmp.lt.s32.totalorder %s27_s12, %s27_s12 }
   0xe   :  { %p94_p5 = scmp.ne.s32.totalorder %s27_s12, %s93_s16  ;;  %p99_p7 = scmp.lt.s32.totalorder %s93_s16, %s93_s16 }
  0x10   :  { %p100_p8 = por %p99_p7, %p98_p6 }
  0x12   :  { %p101_p9 = pnand %p100_p8, %p94_p5 }
  0x14   :  { %104 = shalt.err (!%p101_p9)
}
  0x15   :  { %29 = dma.hbm_to_vmem [thread:$0]  %s159_s1, 256, %s27_s12, [#allocation6]  }
  0x16   :  { %125 = dma.done.wait [#allocation3], 256  }
  0x17   :  { %126 = vsyncadd [#allocation3], 4294967040 }
  0x18   :  { %127 = dma.done.wait [#allocation6], 256  }
  0x19   :  { %128 = vsyncadd [#allocation6], 4294967040  ;;  %v36_v0 = vld [vmem:[#allocation2] sm:$0xff]  ;;  %v38_v1 = vld [vmem:[#allocation5] sm:$0xff]  ;;  %s133_s0 = smov [#allocation7]  }
  0x1a   :  { %v37_v2 = vld [vmem:[#allocation2 + $0x8] sm:$0xff]  ;;  %v40_v3 = vadd.f32 %v38_v1, %v36_v0  ;;  %v39_v4 = vld [vmem:[#allocation5 + $0x8] sm:$0xff]  ;;  %s52_s19 = sshll.u32 %s133_s0, 4  ;;  %s53_s19 = int_to_ptr.vmem [resolvable:$true] %s52_s19 }
  0x1b   :  { %v41_v5 = vadd.f32 %v39_v4, %v37_v2  ;;  %s105_s20 = scalar_lea.vmem %s53_s19, 256  ;;  %p110_p11 = scmp.lt.s32.totalorder %s53_s19, %s53_s19 }
  0x1c   :  { %v42_v6 = vmax.f32 %v40_v3, 0.0  ;;  %p106_p10 = scmp.ne.s32.totalorder %s53_s19, %s105_s20  ;;  %p111_p12 = scmp.lt.s32.totalorder %s105_s20, %s105_s20 }
  0x1d   :  { %v43_v7 = vmax.f32 %v41_v5, 0.0 }
  0x1e   :  { %44 = vst [vmem:[#allocation7] sm:$0xff] %v42_v6  ;;  %p112_p13 = por %p111_p12, %p110_p11 }
  0x1f   :  { %45 = vst [vmem:[#allocation7 + $0x8] sm:$0xff] %v43_v7 }
  0x20   :  { %p113_p0 = pnand %p112_p13, %p106_p10 }
  0x22   :  { %116 = shalt.err (!%p113_p0)
}
  0x23   :  { %55 = dma.vmem_to_hbm [thread:$0]  %s53_s19, 256, %s160_s2, [#allocation4]  }
  0x24   :  { %129 = dma.done.wait [#allocation4], 256  }
  0x25   :  { %130 = vsyncadd [#allocation4], 4294967040 }
  0x26   :  { %59 = vsyncpa [#allocation3], 1 }
  0x27   :  { %60 = vsyncpa [#allocation6], 1 }
  0x28   :  { %61 = vsyncpa [#allocation4], 1 }

</bundles_post_ra>
